<compile_context>
chip_gen: v7x
topology: tpu7x:2x2x1
jax: 0.10.0
libtpu: 0.0.40
codegen_flags: <defaults>
</compile_context>

<pallas_src>
import math

import jax
import jax.numpy as jnp
from jax import lax
from jax.experimental import pallas as pl
from jax.experimental.pallas import tpu as pltpu


def _round_up(x, m):
    return (x + m - 1) // m * m


def _make_kernel(n_actual, n_padded, tile_n):
    needs_mask = n_padded != n_actual
    inv_n = 1.0 / float(n_actual)

    def kernel(data_ref, w1_ref, b1_ref, w2_ref, b2_ref, w3_ref, b3_ref,
               y_ref, x_ref, acc_ref):
        step = pl.program_id(0)

        @pl.when(step == 0)
        def _():
            acc_ref[...] = jnp.zeros_like(acc_ref)

        # fc1 + sigmoid on the current [tile_n, 4] tile (dropout == identity in eval).
        z = jnp.dot(data_ref[...], w1_ref[...],
                    preferred_element_type=jnp.float32) + b1_ref[...]
        h = pl.reciprocal(1.0 + jnp.exp(-z))        # sigmoid: exp + recip on the EUP

        if needs_mask:
            # Zero out rows belonging to the zero-padding of the last tile.
            rows = lax.broadcasted_iota(jnp.int32, h.shape, 0) + step * tile_n
            h = jnp.where(rows < n_actual, h, 0.0)

        # AdaptiveAvgPool1d(1) over the transposed dims == mean over the N axis:
        # accumulate the batch sum across grid steps.
        acc_ref[...] += jnp.sum(h, axis=0, keepdims=True)

        @pl.when(step == pl.num_programs(0) - 1)
        def _():
            pooled = acc_ref[...] * inv_n                                    # [1, 32]
            x = jnp.maximum(
                jnp.dot(pooled, w2_ref[...],
                        preferred_element_type=jnp.float32) + b2_ref[...], 0.0)
            x_ref[...] = x
            y_ref[...] = jnp.dot(x, w3_ref[...],
                                 preferred_element_type=jnp.float32) + b3_ref[...]

    return kernel


def taxpay_forward(tax_pay, params, tile_n=1024):
    """tax_pay: [N, 4] float32. Returns (y [2], x [32]) matching TaxPayModel.forward."""
    w1, b1, w2, b2, w3, b3 = params
    n, f = tax_pay.shape

    tn = min(tile_n, _round_up(n, 8))          # tile rows, multiple of 8 (sublane)
    n_pad = _round_up(n, tn)
    if n_pad != n:
        tax_pay = jnp.pad(tax_pay, ((0, n_pad - n), (0, 0)))
    grid = (pl.cdiv(n_pad, tn),)

    def const_spec(shape):
        nd = len(shape)
        return pl.BlockSpec(shape, lambda i, _nd=nd: (0,) * _nd)

    kernel = _make_kernel(n, n_pad, tn)
    y, x = pl.pallas_call(
        kernel,
        out_shape=(jax.ShapeDtypeStruct((1, 2), jnp.float32),
                   jax.ShapeDtypeStruct((1, 32), jnp.float32)),
        grid_spec=pltpu.PrefetchScalarGridSpec(
            num_scalar_prefetch=0,
            grid=grid,
            in_specs=[pl.BlockSpec((tn, f), lambda i: (i, 0))]      # streamed data tiles
                     + [const_spec(p.shape) for p in (w1, b1, w2, b2, w3, b3)],
            out_specs=(pl.BlockSpec((1, 2), lambda i: (0, 0)),
                       pl.BlockSpec((1, 32), lambda i: (0, 0))),
            scratch_shapes=[pltpu.VMEM((1, 32), jnp.float32)]),      # pooled-sum acc
        compiler_params=pltpu.CompilerParams(
            # Grid axis is a reduction into the shared accumulator -> sequential.
            dimension_semantics=("arbitrary",)),
    )(tax_pay, w1, b1, w2, b2, w3, b3)
    return y[0], x[0]


def _linear_init(key, fan_in, fan_out):
    """PyTorch nn.Linear default init; weight returned pre-transposed to [in, out]."""
    kw, kb = jax.random.split(key)
    bound = 1.0 / math.sqrt(fan_in)
    w = jax.random.uniform(kw, (fan_in, fan_out), jnp.float32, -bound, bound)
    b = jax.random.uniform(kb, (1, fan_out), jnp.float32, -bound, bound)
    return w, b


def make_params(seed=0):
    k1, k2, k3 = jax.random.split(jax.random.PRNGKey(seed), 3)
    w1, b1 = _linear_init(k1, 4, 32)    # fc1
    w2, b2 = _linear_init(k2, 32, 32)   # fc2
    w3, b3 = _linear_init(k3, 32, 2)    # fc3
    return [w1, b1, w2, b2, w3, b3]


def reference_forward(tax_pay, params):
    """Pure-JAX reference with identical math for the correctness check."""
    w1, b1, w2, b2, w3, b3 = params
    h = 1.0 / (1.0 + jnp.exp(-(tax_pay @ w1 + b1)))     # sigmoid(fc1), dropout = identity
    pooled = jnp.mean(h, axis=0, keepdims=True)         # AdaptiveAvgPool1d over N
    x = jnp.maximum(pooled @ w2 + b2, 0.0)               # relu(fc2), dropout = identity
    y = x @ w3 + b3                                       # fc3
    return y[0], x[0]


if __name__ == "__main__":
    N = 8                                   # sequence of tax payments, 4 features each
    tax_pay = jax.random.normal(jax.random.PRNGKey(0), (N, 4), jnp.float32)
    params = make_params(seed=0)

    y, x = taxpay_forward(tax_pay, params)
    y, x = jax.block_until_ready((y, x))

    y_ref, x_ref = reference_forward(tax_pay, params)
    assert y.shape == (2,) and x.shape == (32,)
    assert jnp.allclose(y, y_ref, atol=1e-5, rtol=1e-5), "y mismatch vs reference"
    assert jnp.allclose(x, x_ref, atol=1e-5, rtol=1e-5), "x mismatch vs reference"
    print("KERNEL_OK")
</pallas_src>

<mosaic_0001>
module attributes {stable_mosaic.version = 11 : i64} {
  func.func @kernel(%arg0: i32, %arg1: memref<8x4xf32, #tpu.memory_space<vmem>>, %arg2: memref<4x32xf32, #tpu.memory_space<vmem>>, %arg3: memref<1x32xf32, #tpu.memory_space<vmem>>, %arg4: memref<32x32xf32, #tpu.memory_space<vmem>>, %arg5: memref<1x32xf32, #tpu.memory_space<vmem>>, %arg6: memref<32x2xf32, #tpu.memory_space<vmem>>, %arg7: memref<1x2xf32, #tpu.memory_space<vmem>>, %arg8: memref<1x2xf32, #tpu.memory_space<vmem>>, %arg9: memref<1x32xf32, #tpu.memory_space<vmem>>, %arg10: memref<1x32xf32, #tpu.memory_space<vmem>>) attributes {dimension_semantics = [#tpu.dimension_semantics<arbitrary>], iteration_bounds = array<i64: 1>, scalar_prefetch = 0 : i64, scratch_operands = 1 : i64, tpu.core_type = #tpu.core_type<tc>, window_params = [{transform_indices = @transform_0, window_bounds = array<i64: 8, 4>}, {pipeline_mode = #tpu.pipeline_mode<synchronous>, transform_indices = @transform_1, window_bounds = array<i64: 4, 32>}, {pipeline_mode = #tpu.pipeline_mode<synchronous>, transform_indices = @transform_2, window_bounds = array<i64: 1, 32>}, {pipeline_mode = #tpu.pipeline_mode<synchronous>, transform_indices = @transform_3, window_bounds = array<i64: 32, 32>}, {pipeline_mode = #tpu.pipeline_mode<synchronous>, transform_indices = @transform_4, window_bounds = array<i64: 1, 32>}, {pipeline_mode = #tpu.pipeline_mode<synchronous>, transform_indices = @transform_5, window_bounds = array<i64: 32, 2>}, {pipeline_mode = #tpu.pipeline_mode<synchronous>, transform_indices = @transform_6, window_bounds = array<i64: 1, 2>}, {pipeline_mode = #tpu.pipeline_mode<synchronous>, transform_indices = @transform_7, window_bounds = array<i64: 1, 2>}, {pipeline_mode = #tpu.pipeline_mode<synchronous>, transform_indices = @transform_8, window_bounds = array<i64: 1, 32>}]} {
    %c0_i32 = arith.constant 0 : i32
    %0 = arith.cmpi eq, %arg0, %c0_i32 : i32
    %1 = arith.extui %0 : i1 to i32
    %c0_i32_0 = arith.constant 0 : i32
    %2 = arith.cmpi ne, %1, %c0_i32_0 : i32
    scf.if %2 {
      %cst_15 = arith.constant 0.000000e+00 : f32
      %23 = vector.broadcast %cst_15 : f32 to vector<1x32xf32>
      %c0_16 = arith.constant 0 : index
      %c0_17 = arith.constant 0 : index
      %24 = vector.load %arg10[%c0_16, %c0_17] : memref<1x32xf32, #tpu.memory_space<vmem>>, vector<1x32xf32>
      tpu.vector_store %arg10[%c0_16, %c0_17], %23 {strides = array<i32>} : memref<1x32xf32, #tpu.memory_space<vmem>>, vector<1x32xf32>,
    } else {
    }
    %c0 = arith.constant 0 : index
    %c0_1 = arith.constant 0 : index
    %3 = vector.load %arg1[%c0, %c0_1] : memref<8x4xf32, #tpu.memory_space<vmem>>, vector<8x4xf32>
    %c0_2 = arith.constant 0 : index
    %c0_3 = arith.constant 0 : index
    %4 = vector.load %arg2[%c0_2, %c0_3] : memref<4x32xf32, #tpu.memory_space<vmem>>, vector<4x32xf32>
    %cst = arith.constant dense<0.000000e+00> : vector<8x32xf32>
    %5 = tpu.matmul %3, %4, %cst {dimension_numbers = #tpu.dot_dimension_numbers<[1], [0], [0], [1], [0, 0, 1, 1], [], []>} : vector<8x4xf32>, vector<4x32xf32>, vector<8x32xf32> -> vector<8x32xf32>
    %c0_4 = arith.constant 0 : index
    %c0_5 = arith.constant 0 : index
    %6 = vector.load %arg3[%c0_4, %c0_5] : memref<1x32xf32, #tpu.memory_space<vmem>>, vector<1x32xf32>
    %7 = vector.broadcast %6 : vector<1x32xf32> to vector<8x32xf32>
    %8 = arith.addf %5, %7 : vector<8x32xf32>
    %cst_6 = arith.constant 0.000000e+00 : f32
    %9 = vector.broadcast %cst_6 : f32 to vector<8x32xf32>
    %10 = arith.subf %9, %8 : vector<8x32xf32>
    %11 = math.exp %10 : vector<8x32xf32>
    %cst_7 = arith.constant 1.000000e+00 : f32
    %12 = vector.broadcast %cst_7 : f32 to vector<8x32xf32>
    %13 = arith.addf %12, %11 : vector<8x32xf32>
    %14 = tpu.reciprocal %13 : vector<8x32xf32> -> vector<8x32xf32>
    %c0_8 = arith.constant 0 : index
    %c0_9 = arith.constant 0 : index
    %15 = vector.load %arg10[%c0_8, %c0_9] : memref<1x32xf32, #tpu.memory_space<vmem>>, vector<1x32xf32>
    %cst_10 = arith.constant dense<0.000000e+00> : vector<32xf32>
    %16 = vector.multi_reduction <add>, %14, %cst_10 [0] : vector<8x32xf32> to vector<32xf32>
    %17 = vector.shape_cast %16 : vector<32xf32> to vector<1x32xf32>
    %18 = arith.addf %15, %17 : vector<1x32xf32>
    %c0_11 = arith.constant 0 : index
    %c0_12 = arith.constant 0 : index
    %19 = vector.load %arg10[%c0_11, %c0_12] : memref<1x32xf32, #tpu.memory_space<vmem>>, vector<1x32xf32>
    tpu.vector_store %arg10[%c0_11, %c0_12], %18 {strides = array<i32>} : memref<1x32xf32, #tpu.memory_space<vmem>>, vector<1x32xf32>,
    %c0_i32_13 = arith.constant 0 : i32
    %20 = arith.cmpi eq, %arg0, %c0_i32_13 : i32
    %21 = arith.extui %20 : i1 to i32
    %c0_i32_14 = arith.constant 0 : i32
    %22 = arith.cmpi ne, %21, %c0_i32_14 : i32
    scf.if %22 {
      %c0_15 = arith.constant 0 : index
      %c0_16 = arith.constant 0 : index
      %23 = vector.load %arg10[%c0_15, %c0_16] : memref<1x32xf32, #tpu.memory_space<vmem>>, vector<1x32xf32>
      %cst_17 = arith.constant 1.250000e-01 : f32
      %24 = vector.broadcast %cst_17 : f32 to vector<1x32xf32>
      %25 = arith.mulf %23, %24 : vector<1x32xf32>
      %c0_18 = arith.constant 0 : index
      %c0_19 = arith.constant 0 : index
      %26 = vector.load %arg4[%c0_18, %c0_19] : memref<32x32xf32, #tpu.memory_space<vmem>>, vector<32x32xf32>
      %cst_20 = arith.constant dense<0.000000e+00> : vector<1x32xf32>
      %27 = tpu.matmul %25, %26, %cst_20 {dimension_numbers = #tpu.dot_dimension_numbers<[1], [0], [0], [1], [0, 0, 1, 1], [], []>} : vector<1x32xf32>, vector<32x32xf32>, vector<1x32xf32> -> vector<1x32xf32>
      %c0_21 = arith.constant 0 : index
      %c0_22 = arith.constant 0 : index
      %28 = vector.load %arg5[%c0_21, %c0_22] : memref<1x32xf32, #tpu.memory_space<vmem>>, vector<1x32xf32>
      %29 = arith.addf %27, %28 : vector<1x32xf32>
      %cst_23 = arith.constant 0.000000e+00 : f32
      %30 = vector.broadcast %cst_23 : f32 to vector<1x32xf32>
      %31 = arith.maximumf %29, %30 : vector<1x32xf32>
      %c0_24 = arith.constant 0 : index
      %c0_25 = arith.constant 0 : index
      %32 = vector.load %arg9[%c0_24, %c0_25] : memref<1x32xf32, #tpu.memory_space<vmem>>, vector<1x32xf32>
      tpu.vector_store %arg9[%c0_24, %c0_25], %31 {strides = array<i32>} : memref<1x32xf32, #tpu.memory_space<vmem>>, vector<1x32xf32>,
      %c0_26 = arith.constant 0 : index
      %c0_27 = arith.constant 0 : index
      %33 = vector.load %arg6[%c0_26, %c0_27] : memref<32x2xf32, #tpu.memory_space<vmem>>, vector<32x2xf32>
      %cst_28 = arith.constant dense<0.000000e+00> : vector<1x2xf32>
      %34 = tpu.matmul %31, %33, %cst_28 {dimension_numbers = #tpu.dot_dimension_numbers<[1], [0], [0], [1], [0, 0, 1, 1], [], []>} : vector<1x32xf32>, vector<32x2xf32>, vector<1x2xf32> -> vector<1x2xf32>
      %c0_29 = arith.constant 0 : index
      %c0_30 = arith.constant 0 : index
      %35 = vector.load %arg7[%c0_29, %c0_30] : memref<1x2xf32, #tpu.memory_space<vmem>>, vector<1x2xf32>
      %36 = arith.addf %34, %35 : vector<1x2xf32>
      %c0_31 = arith.constant 0 : index
      %c0_32 = arith.constant 0 : index
      %37 = vector.load %arg8[%c0_31, %c0_32] : memref<1x2xf32, #tpu.memory_space<vmem>>, vector<1x2xf32>
      tpu.vector_store %arg8[%c0_31, %c0_32], %36 {strides = array<i32>} : memref<1x2xf32, #tpu.memory_space<vmem>>, vector<1x2xf32>,
    } else {
    }
    return
  }
  func.func @transform_0(%arg0: i32) -> (i32, i32) {
    %c0_i32 = arith.constant 0 : i32
    %c0_i32_0 = arith.constant 0 : i32
    return %arg0, %c0_i32 : i32, i32
  }
  func.func @transform_1(%arg0: i32) -> (i32, i32) {
    %c0_i32 = arith.constant 0 : i32
    %c0_i32_0 = arith.constant 0 : i32
    %c0_i32_1 = arith.constant 0 : i32
    return %c0_i32, %c0_i32_0 : i32, i32
  }
  func.func @transform_2(%arg0: i32) -> (i32, i32) {
    %c0_i32 = arith.constant 0 : i32
    %c0_i32_0 = arith.constant 0 : i32
    %c0_i32_1 = arith.constant 0 : i32
    return %c0_i32, %c0_i32_0 : i32, i32
  }
  func.func @transform_3(%arg0: i32) -> (i32, i32) {
    %c0_i32 = arith.constant 0 : i32
    %c0_i32_0 = arith.constant 0 : i32
    %c0_i32_1 = arith.constant 0 : i32
    return %c0_i32, %c0_i32_0 : i32, i32
  }
  func.func @transform_4(%arg0: i32) -> (i32, i32) {
    %c0_i32 = arith.constant 0 : i32
    %c0_i32_0 = arith.constant 0 : i32
    %c0_i32_1 = arith.constant 0 : i32
    return %c0_i32, %c0_i32_0 : i32, i32
  }
  func.func @transform_5(%arg0: i32) -> (i32, i32) {
    %c0_i32 = arith.constant 0 : i32
    %c0_i32_0 = arith.constant 0 : i32
    %c0_i32_1 = arith.constant 0 : i32
    return %c0_i32, %c0_i32_0 : i32, i32
  }
  func.func @transform_6(%arg0: i32) -> (i32, i32) {
    %c0_i32 = arith.constant 0 : i32
    %c0_i32_0 = arith.constant 0 : i32
    %c0_i32_1 = arith.constant 0 : i32
    return %c0_i32, %c0_i32_0 : i32, i32
  }
  func.func @transform_7(%arg0: i32) -> (i32, i32) {
    %c0_i32 = arith.constant 0 : i32
    %c0_i32_0 = arith.constant 0 : i32
    %c0_i32_1 = arith.constant 0 : i32
    return %c0_i32, %c0_i32_0 : i32, i32
  }
  func.func @transform_8(%arg0: i32) -> (i32, i32) {
    %c0_i32 = arith.constant 0 : i32
    %c0_i32_0 = arith.constant 0 : i32
    %c0_i32_1 = arith.constant 0 : i32
    return %c0_i32, %c0_i32_0 : i32, i32
  }
}

</mosaic_0001>

<bundles_post_ra>
// kernel: tpu_custom_call.1
= control target key start
LH: loop header
LB: loop body
LE: loop exit
PB: predicated region body
PF: predicated region fallthrough
CT: control target
= control target key end

     0   :  { %14 = vsyncpa [#allocation4], 0  ;;  %vm34_vm0 = vcmask 253952   ;;  %vm49_vm1 = vcmask 1043456   ;;  %v446_v1 = vmov 0.0   ;;  %vm447_vm2 = vmmov 0   ;;  %s565_s0 = inlined_call_operand.vmem [shape: f32[8,4], index: 0, kind: input, shape index: {}]   ;;  %s566_s1 = inlined_call_operand.vmem [shape: f32[4,32], index: 1, kind: input, shape index: {}]   ;;  %s567_s2 = inlined_call_operand.vmem [shape: f32[1,32], index: 2, kind: input, shape index: {}]   ;;  %s568_s3 = inlined_call_operand.vmem [shape: f32[32,32], index: 3, kind: input, shape index: {}]   ;;  %s569_s4 = inlined_call_operand.vmem [shape: f32[1,32], index: 4, kind: input, shape index: {}]   ;;  %s570_s5 = inlined_call_operand.vmem [shape: f32[32,2], index: 5, kind: input, shape index: {}]   ;;  %s571_s6 = inlined_call_operand.vmem [shape: f32[1,2], index: 6, kind: input, shape index: {}]   ;;  %s572_s7 = inlined_call_operand.hbm [shape: f32[1,2], index: 7, kind: output, shape index: {0}]   ;;  %s573_s8 = inlined_call_operand.hbm [shape: f32[1,32], index: 8, kind: output, shape index: {1}]  }
   0x1   :  { %v37_v0 = vld [vmem:[%s566_s1] sm:$0xf]  ;;  %35 = vst.msk [vmem:[#allocation2] sm:$0x1] %vm34_vm0, %v446_v1  ;;  %350 = vmatprep.subr.mxu0 %v446_v1  ;;  %352 = vmatprep.mubr.msk.f32.mxu0 %vm447_vm2, %v446_v1  ;;  %vm45_vm3 = vcmask 31744  }
   0x2   :  { %v36_v2 = vld [vmem:[%s565_s0] sm:$0xff] }
   0x3   :  { %15 = vsyncpa [#allocation6], 0  ;;  %351 = vmatpush3.msk.msra.mxu0 %vm49_vm1, %v37_v0  ;;  %363 = vmatprep.mubr.msk.f32.mxu1 %vm447_vm2, %v446_v1  ;;  %v145_v3 = vld [vmem:[%s568_s3] sm:$0xff]  ;;  %v146_v4 = vld [vmem:[%s568_s3 + $0x8] sm:$0xff]  ;;  %v448_v6 = vmov 0.0|0.0   ;;  %vm129_vm4 = vcmask 261120  }
   0x4   :  { %353 = vmatmul.mubr.msk.f32.vlgmr.msra.gmra.mrb[0].mxu0 %vm45_vm3, %v36_v2  ;;  %v147_v5 = vld [vmem:[%s568_s3 + $0x10] sm:$0xff]  ;;  %377 = vmatprep.subr.bf16.mxu1 %v448_v6  ;;  %v378_v7 = vpack.c.bf16 %v146_v4, %v145_v3  ;;  %v148_v8 = vld [vmem:[%s568_s3 + $0x18] sm:$0xff]  ;;  %v225_v10 = vld [vmem:[%s570_s5] sm:$0xff]  ;;  %s449_s25 = smov [#allocation5]  }
   0x5   :  { %374 = vmatprep.mubr.msk.f32.mxu0 %vm447_vm2, %v446_v1  ;;  %383 = vmatprep.subr.bf16.mxu0 %v448_v6  ;;  %v381_v9 = vpack.c.bf16 %v148_v8, %v147_v5  ;;  %v226_v11 = vld [vmem:[%s570_s5 + $0x8] sm:$0xff]  ;;  %v333_v13 = vld [vmem:[%s567_s2] ss:$0 sm:$0xff]  ;;  %v227_v33 = vld [vmem:[%s570_s5 + $0x10] sm:$0xff]  ;;  %s321_s26 = sshll.u32 %s449_s25, 4  ;;  %s322_s26 = int_to_ptr.vmem [resolvable:$true] %s321_s26 }
   0x6   :  { %379 = vmatpush3.bf16.msra.mxu1 %v378_v7  ;;  %v384_v12 = vpack.c.bf16 %v226_v11, %v225_v10  ;;  %v228_v34 = vld [vmem:[%s570_s5 + $0x18] sm:$0xff]  ;;  %v149_v36 = vld [vmem:[%s569_s4] sm:$0x1]  ;;  %s398_s27 = scalar_lea.vmem %s322_s26, 16  ;;  %s402_s5 = scalar_lea.vmem %s322_s26, 32 }
   0x7   :  { %380 = vmatprep.subr.bf16.mxu1 %v448_v6  ;;  %v387_v35 = vpack.c.bf16 %v228_v34, %v227_v33  ;;  %p399_p0 = scmp.ne.s32.totalorder %s322_s26, %s398_s27  ;;  %p403_p1 = scmp.lt.s32.totalorder %s322_s26, %s322_s26 }
   0x8   :  { %385 = vmatpush3.bf16.msra.mxu0 %v384_v12  ;;  %v128_v28 = vld [vmem:[#allocation2] sm:$0x1]  ;;  %p404_p2 = scmp.lt.s32.totalorder %s402_s5, %s398_s27 }
   0x9   :  { %386 = vmatprep.subr.bf16.mxu0 %v448_v6 }
   0xa   :  { %382 = vmatpush3.bf16.msra.mxu1 %v381_v9  ;;  %p405_p3 = por %p404_p2, %p403_p1 }
   0xc   :  { %388 = vmatpush3.bf16.msra.mxu0 %v387_v35  ;;  %p406_p4 = pnand %p405_p3, %p399_p0 }
  0xd7   :  { %v119_v14 = vpop.f32.mrb[0].mxu0 }
  0xd8   :  { %v120_v15 = vadd.f32 %v333_v13, %v119_v14  ;;  %v354_v16 = vpop.f32.mrb[1].mxu0 }
  0xda   :  { %v123_v17 = vsub.f32 0.0, %v120_v15 }
  0xdc   :  { %v124_v18 = vmul.f32 1.442695, %v123_v17 }
  0xde   :  { %394 = vpow2.f32 %v124_v18 }
  0xe8   :  { %v395_v19 = vpop.eup %394 }
  0xe9   :  { %v126_v20 = vadd.f32 1.0, %v395_v19 }
  0xeb   :  { %396 = vrcp.f32 %v126_v20 }
  0xf5   :  { %v397_v21 = vpop.eup %396 }
  0xf6   :  { %v130_v22 = vsel %vm129_vm4, %v397_v21, 0.0 }
  0xf7   :  { %v131_v23 = vrot.slane %v130_v22, 4 }
  0xf9   :  { %v132_v24 = vadd.f32 %v131_v23, %v130_v22 }
  0xfb   :  { %v133_v25 = vrot.slane %v132_v24, 2 }
  0xfd   :  { %v134_v26 = vadd.f32 %v133_v25, %v132_v24 }
  0xff   :  { %v135_v27 = vrot.slane %v134_v26, 1 }
 0x101   :  { %v136_v29 = vadd.f32 %v135_v27, %v134_v26 }
 0x103   :  { %v137_v30 = vadd.f32 %v136_v29, %v128_v28 }
 0x105   :  { %139 = vst.msk [vmem:[#allocation2] sm:$0x1] %vm34_vm0, %v137_v30 }
 0x10c   :  { %v143_v31 = vld [vmem:[#allocation2] sm:$0x1] }
 0x10d   :  { %v144_v32 = vmul.f32 0.125, %v143_v31 }
 0x10f   :  { %364 = vmatmul.mubr.msk.f32.vlgmr.msra.gmra.mrb[0].mxu1 %vm129_vm4, %v144_v32 }
 0x1e2   :  { %v219_v37 = vpop.f32.mrb[0].mxu1 }
 0x1e3   :  { %v220_v38 = vadd.f32 %v219_v37, %v149_v36  ;;  %v365_v39 = vpop.f32.mrb[1].mxu1 }
 0x1e5   :  { %v223_v40 = vmax.f32 %v220_v38, 0.0 }
 0x1e7   :  { %224 = vst.msk [vmem:[#allocation5] sm:$0x1] %vm34_vm0, %v223_v40  ;;  %375 = vmatmul.mubr.msk.f32.vlgmr.msra.gmra.mrb[2].mxu0 %vm129_vm4, %v223_v40 }
 0x1e8   :  { %409 = shalt.err (!%p406_p4)
}
 0x1e9   :  { %s410_s29 = scalar_lea.hbm %s573_s8, 16 }
 0x1ea   :  { %p411_p5 = scmp.ne.s32.totalorder %s573_s8, %s410_s29  ;;  %p414_p6 = scmp.lt.u32.totalorder %s410_s29, %s573_s8 }
 0x1ec   :  { %p416_p7 = pnand %p414_p6, %p411_p5 }
 0x1ee   :  { %419 = shalt.err (!%p416_p7)
}
 0x1ef   :  { %324 = dma.vmem_to_hbm [thread:$0]  %s322_s26, 16, %s573_s8, [#allocation6]   ;;  %v229_v41 = vld [vmem:[%s571_s6] sm:$0x1]  ;;  %vm303_vm5 = vcmask 8192  }
 0x1f0   :  { %s450_s14 = smov [#allocation3]  }
 0x1f1   :  { %s311_s15 = sshll.u32 %s450_s14, 4  ;;  %s312_s15 = int_to_ptr.vmem [resolvable:$true] %s311_s15 }
 0x1f2   :  { %s420_s16 = scalar_lea.vmem %s312_s15, 16  ;;  %s424_s17 = scalar_lea.vmem %s312_s15, 32 }
 0x1f3   :  { %p421_p8 = scmp.ne.s32.totalorder %s312_s15, %s420_s16  ;;  %p425_p9 = scmp.lt.s32.totalorder %s312_s15, %s312_s15 }
 0x1f4   :  { %p426_p10 = scmp.lt.s32.totalorder %s424_s17, %s420_s16 }
 0x1f6   :  { %p427_p11 = por %p426_p10, %p425_p9 }
 0x1f8   :  { %p428_p12 = pnand %p427_p11, %p421_p8 }
 0x2ba   :  { %v299_v42 = vpop.f32.mrb[2].mxu0 }
 0x2bb   :  { %v300_v43 = vadd.f32 %v299_v42, %v229_v41  ;;  %v376_v44 = vpop.f32.mrb[3].mxu0 }
 0x2bd   :  { %304 = vst.msk [vmem:[#allocation3] sm:$0x1] %vm303_vm5, %v300_v43 }
 0x2be   :  { %431 = shalt.err (!%p428_p12)
}
 0x2bf   :  { %s432_s6 = scalar_lea.hbm %s572_s7, 16 }
 0x2c0   :  { %p433_p13 = scmp.ne.s32.totalorder %s572_s7, %s432_s6  ;;  %p436_p0 = scmp.lt.u32.totalorder %s432_s6, %s572_s7 }
 0x2c2   :  { %p438_p1 = pnand %p436_p0, %p433_p13 }
 0x2c4   :  { %441 = shalt.err (!%p438_p1)
}
 0x2c5   :  { %314 = dma.vmem_to_hbm [thread:$0]  %s312_s15, 16, %s572_s7, [#allocation4]  }
 0x2c6   :  { %442 = dma.done.wait [#allocation4], 16  }
 0x2c7   :  { %443 = vsyncadd [#allocation4], 4294967280 }
 0x2c8   :  { %444 = dma.done.wait [#allocation6], 16  }
 0x2c9   :  { %445 = vsyncadd [#allocation6], 4294967280 }
 0x2ca   :  { %331 = vsyncpa [#allocation4], 1 }
 0x2cb   :  { %332 = vsyncpa [#allocation6], 1 }

</bundles_post_ra>
